<compile_context>
chip_gen: v7x
topology: tpu7x:2x2x1
jax: 0.10.0
libtpu: 0.0.40
codegen_flags: <defaults>
</compile_context>

<pallas_src>
import jax
import jax.numpy as jnp
from jax.experimental import pallas as pl
from jax.experimental.pallas import tpu as pltpu


def _round_up(x, m):
    return ((x + m - 1) // m) * m


def _vmem_budget_bytes():
    """3/4 of physical VMEM: ~96 MiB on v5e/v6e (128 MiB), ~48 MiB on v7x (64 MiB)."""
    try:
        cap = int(pltpu.get_tpu_info().vmem_capacity_bytes)
    except Exception:
        cap = 64 * 1024 * 1024  # v7x-safe fallback if the query is unavailable
    return (cap * 3) // 4


def _pick_vocab_tile(V, D, T, Bp, Cp, budget_bytes):
    """Largest vocab tile Vt such that the whole kernel footprint fits in budget_bytes.

    Counts: double-buffered (Vt, D) f32 emb tile (lane-padded to 128), the in-kernel
    tok_onehot / bow temporaries (scale with Vt), and all resident buffers.
    """
    Dl = max(D, 128)                      # minor dim lane-pads to 128 in VMEM
    Tl = _round_up(T, 128)
    resident = (
        2 * Bp * Tl * 2                   # seg one-hot (bf16, double-buffered input)
        + 2 * Bp * 128 * 4                # inverse counts
        + 2 * _round_up(T, 8) * 128 * 4   # token ids (T, 1) int32
        + 2 * _round_up(D, 8) * Cp * 4    # classifier weight (D, Cp)
        + 2 * 8 * Cp * 4                  # bias (1, Cp)
        + 2 * Bp * Cp * 4                 # output block
        + Bp * Dl * 4                     # f32 accumulator scratch
        + Bp * Dl * 4 + Bp * Cp * 4       # finalize temporaries (mean, logits)
    )
    margin = 4 * 1024 * 1024              # compiler-internal scratch headroom
    avail = max(budget_bytes - resident - margin, 2 * 8 * Dl * 4)
    # bytes per unit of Vt: 2x-buffered emb tile + tok_onehot (+ its int32/bool
    # intermediates, conservatively 8 B/elem) + bow row
    per_vt = 2 * Dl * 4 + T * 8 + Bp * 4
    vt = max(8, (avail // per_vt) // 8 * 8)
    return min(vt, _round_up(V, 8))


def embed_classifier_kernel(text_ref, seg1h_ref, inv_ref, emb_ref, w_ref, b_ref,
                            o_ref, acc_ref):
    """Grid axis 0 iterates vocab tiles (reduction axis, 'arbitrary').

    text_ref : (T, 1)  int32  token ids                      (resident)
    seg1h_ref: (Bp, T) bf16   bag one-hot (hoisted)          (resident)
    inv_ref  : (Bp, 1) f32    1 / per-bag token count        (resident)
    emb_ref  : (Vt, D) f32    embedding-table tile           (streamed over V)
    w_ref    : (D, Cp) f32    classifier weight (transposed) (resident)
    b_ref    : (1, Cp) f32    classifier bias                (resident)
    o_ref    : (Bp, Cp) f32   logits (lane-dense)
    acc_ref  : (Bp, D)  f32   per-bag embedding-sum accumulator (VMEM scratch)
    """
    k = pl.program_id(0)
    n_k = pl.num_programs(0)
    T = text_ref.shape[0]
    Vt = emb_ref.shape[0]

    @pl.when(k == 0)
    def _():
        acc_ref[...] = jnp.zeros_like(acc_ref)

    # token one-hot restricted to this vocab tile: (T, Vt), bf16 (0/1 exact -> MXU)
    tok_col = text_ref[...]                                     # (T, 1) int32
    col_iota = jax.lax.broadcasted_iota(jnp.int32, (T, Vt), 1)
    tok_onehot = ((tok_col - k * Vt) == col_iota).astype(jnp.bfloat16)

    # bag-of-words counts for this tile: (Bp, T) @ (T, Vt) -> (Bp, Vt), exact in f32
    bow = jnp.dot(seg1h_ref[...], tok_onehot, preferred_element_type=jnp.float32)

    # accumulate per-bag embedding sums: (Bp, Vt) @ (Vt, D) -> (Bp, D)
    acc_ref[...] += jnp.dot(bow, emb_ref[...], preferred_element_type=jnp.float32)

    @pl.when(k == n_k - 1)
    def _():
        mean = acc_ref[...] * inv_ref[...]                      # (Bp, D)
        o_ref[...] = (jnp.dot(mean, w_ref[...],
                              preferred_element_type=jnp.float32) + b_ref[...])


def embed_classifier(text, off, emb, w, b):
    """text: (T,) int32 token ids, off: (B,) int32 bag start offsets (off[0] == 0),
    emb: (V, D) f32, w: (C, D) f32 (torch Linear weight), b: (C,) f32."""
    T = text.shape[0]
    B = off.shape[0]
    V, D = emb.shape
    C = w.shape[0]

    # glue: per-token bag id from offsets (same semantics as EmbeddingBag offsets)
    seg_ids = (jnp.searchsorted(off, jnp.arange(T, dtype=jnp.int32),
                                side="right") - 1).astype(jnp.int32)

    # padding for lane-dense output and (8,128)-friendly tiles
    Bp = _round_up(max(B, 8), 8)
    Cp = _round_up(C, 128)

    # ---- hoisted loop invariants (built once, resident in VMEM) ----
    seg_onehot = (seg_ids[None, :] ==
                  jnp.arange(Bp, dtype=jnp.int32)[:, None]).astype(jnp.bfloat16)   # (Bp, T)
    counts = jnp.sum(seg_onehot.astype(jnp.float32), axis=1, keepdims=True)        # (Bp, 1)
    inv_counts = (1.0 / jnp.maximum(counts, 1.0)).astype(jnp.float32)              # (Bp, 1)

    budget = _vmem_budget_bytes()
    Vt = _pick_vocab_tile(V, D, T, Bp, Cp, budget)
    Vp = _round_up(V, Vt)
    n_k = Vp // Vt

    emb_p = jnp.pad(emb.astype(jnp.float32), ((0, Vp - V), (0, 0)))
    w_tp = jnp.pad(w.T.astype(jnp.float32), ((0, 0), (0, Cp - C)))
    b_p = jnp.pad(b.astype(jnp.float32).reshape(1, C), ((0, 0), (0, Cp - C)))
    text_col = text.astype(jnp.int32).reshape(T, 1)       # token ids along sublanes

    cost = pl.CostEstimate(
        flops=2 * Bp * T * Vp + 2 * Bp * Vp * D + 2 * Bp * D * Cp,
        transcendentals=0,
        bytes_accessed=(Vp * D * 4 + T * 4 + Bp * T * 2 + Bp * 4
                        + D * Cp * 4 + Cp * 4 + Bp * Cp * 4),
    )

    out_p = pl.pallas_call(
        embed_classifier_kernel,
        out_shape=jax.ShapeDtypeStruct((Bp, Cp), jnp.float32),
        grid=(n_k,),
        in_specs=[
            pl.BlockSpec((T, 1), lambda k: (0, 0)),     # token ids        (resident)
            pl.BlockSpec((Bp, T), lambda k: (0, 0)),    # bag one-hot      (resident)
            pl.BlockSpec((Bp, 1), lambda k: (0, 0)),    # inverse counts   (resident)
            pl.BlockSpec((Vt, D), lambda k: (k, 0)),    # embedding table, tiled over V
            pl.BlockSpec((D, Cp), lambda k: (0, 0)),    # classifier weight (resident)
            pl.BlockSpec((1, Cp), lambda k: (0, 0)),    # bias             (resident)
        ],
        out_specs=pl.BlockSpec((Bp, Cp), lambda k: (0, 0)),
        scratch_shapes=[pltpu.VMEM((Bp, D), jnp.float32)],
        compiler_params=pltpu.CompilerParams(
            dimension_semantics=("arbitrary",),         # V is a reduction axis
            vmem_limit_bytes=budget,                    # same budget the tile picker used
        ),
        cost_estimate=cost,
    )(text_col, seg_onehot, inv_counts, emb_p, w_tp, b_p)

    return out_p[:B, :C]


def reference(text, off, emb, w_t, b):
    """Pure-JAX reference mirroring torch.nn.EmbeddingBag(mode='mean') + Linear."""
    T = text.shape[0]
    seg_ids = jnp.searchsorted(off, jnp.arange(T), side="right") - 1
    gathered = emb[text]  # (T, D)
    B = off.shape[0]
    sums = jnp.zeros((B, emb.shape[1]), jnp.float32).at[seg_ids].add(gathered)
    counts = jnp.maximum(
        jnp.zeros((B,), jnp.float32).at[seg_ids].add(1.0), 1.0)[:, None]
    bag_mean = sums / counts
    return bag_mean @ w_t + b[None, :]


if __name__ == "__main__":
    vocab_size = 32
    embed_dim = 32
    num_class = 4
    T = 16   # total number of tokens across all bags
    B = 2    # number of bags (batch)

    key = jax.random.PRNGKey(0)
    k_emb, k_w, k_b, k_txt = jax.random.split(key, 4)

    # deterministic parameter init (shapes from the module's __init__)
    emb = jax.random.normal(k_emb, (vocab_size, embed_dim), jnp.float32)
    w = jax.random.normal(k_w, (num_class, embed_dim), jnp.float32) * 0.1  # torch Linear weight (C, D)
    b = jax.random.normal(k_b, (num_class,), jnp.float32) * 0.1

    text = jax.random.randint(k_txt, (T,), 0, vocab_size, jnp.int32)
    off = jnp.array([0, 7], dtype=jnp.int32)  # bag 0: tokens [0,7), bag 1: [7,T)

    out = embed_classifier(text, off, emb, w, b)
    out = jax.block_until_ready(out)

    ref = reference(text, off, emb, w.T, b)
    assert out.shape == (B, num_class)
    assert jnp.allclose(out, ref, atol=1e-4, rtol=1e-4), (out, ref)

    print("KERNEL_OK")
</pallas_src>

<mosaic_0001>
module attributes {stable_mosaic.version = 11 : i64} {
  func.func @embed_classifier_kernel(%arg0: i32, %arg1: memref<16x1xi32, #tpu.memory_space<vmem>>, %arg2: memref<8x16xbf16, #tpu.memory_space<vmem>>, %arg3: memref<8x1xf32, #tpu.memory_space<vmem>>, %arg4: memref<32x32xf32, #tpu.memory_space<vmem>>, %arg5: memref<32x128xf32, #tpu.memory_space<vmem>>, %arg6: memref<1x128xf32, #tpu.memory_space<vmem>>, %arg7: memref<8x128xf32, #tpu.memory_space<vmem>>, %arg8: memref<8x32xf32, #tpu.memory_space<vmem>>) attributes {dimension_semantics = [#tpu.dimension_semantics<arbitrary>], iteration_bounds = array<i64: 1>, scalar_prefetch = 0 : i64, scratch_operands = 1 : i64, tpu.core_type = #tpu.core_type<tc>, window_params = [{pipeline_mode = #tpu.pipeline_mode<synchronous>, transform_indices = @transform_0, window_bounds = array<i64: 16, 1>}, {pipeline_mode = #tpu.pipeline_mode<synchronous>, transform_indices = @transform_1, window_bounds = array<i64: 8, 16>}, {pipeline_mode = #tpu.pipeline_mode<synchronous>, transform_indices = @transform_2, window_bounds = array<i64: 8, 1>}, {transform_indices = @transform_3, window_bounds = array<i64: 32, 32>}, {pipeline_mode = #tpu.pipeline_mode<synchronous>, transform_indices = @transform_4, window_bounds = array<i64: 32, 128>}, {pipeline_mode = #tpu.pipeline_mode<synchronous>, transform_indices = @transform_5, window_bounds = array<i64: 1, 128>}, {pipeline_mode = #tpu.pipeline_mode<synchronous>, transform_indices = @transform_6, window_bounds = array<i64: 8, 128>}]} {
    %c0_i32 = arith.constant 0 : i32
    %0 = arith.cmpi eq, %arg0, %c0_i32 : i32
    %1 = arith.extui %0 : i1 to i32
    %c0_i32_0 = arith.constant 0 : i32
    %2 = arith.cmpi ne, %1, %c0_i32_0 : i32
    scf.if %2 {
      %cst_13 = arith.constant 0.000000e+00 : f32
      %23 = vector.broadcast %cst_13 : f32 to vector<8x32xf32>
      %c0_14 = arith.constant 0 : index
      %c0_15 = arith.constant 0 : index
      %24 = vector.load %arg8[%c0_14, %c0_15] : memref<8x32xf32, #tpu.memory_space<vmem>>, vector<8x32xf32>
      tpu.vector_store %arg8[%c0_14, %c0_15], %23 {strides = array<i32>} : memref<8x32xf32, #tpu.memory_space<vmem>>, vector<8x32xf32>,
    } else {
    }
    %c0 = arith.constant 0 : index
    %c0_1 = arith.constant 0 : index
    %3 = vector.load %arg1[%c0, %c0_1] : memref<16x1xi32, #tpu.memory_space<vmem>>, vector<16x1xi32>
    %4 = tpu.iota {dimensions = array<i32: 1>} : vector<16x32xi32>
    %c32_i32 = arith.constant 32 : i32
    %5 = arith.muli %arg0, %c32_i32 : i32
    %6 = vector.broadcast %5 : i32 to vector<16x1xi32>
    %7 = arith.subi %3, %6 : vector<16x1xi32>
    %8 = vector.broadcast %7 : vector<16x1xi32> to vector<16x32xi32>
    %9 = arith.cmpi eq, %8, %4 : vector<16x32xi32>
    %10 = arith.extui %9 : vector<16x32xi1> to vector<16x32xi32>
    %11 = arith.sitofp %10 : vector<16x32xi32> to vector<16x32xf32>
    %12 = arith.truncf %11 : vector<16x32xf32> to vector<16x32xbf16>
    %c0_2 = arith.constant 0 : index
    %c0_3 = arith.constant 0 : index
    %13 = vector.load %arg2[%c0_2, %c0_3] : memref<8x16xbf16, #tpu.memory_space<vmem>>, vector<8x16xbf16>
    %cst = arith.constant dense<0.000000e+00> : vector<8x32xf32>
    %14 = tpu.matmul %13, %12, %cst {dimension_numbers = #tpu.dot_dimension_numbers<[1], [0], [0], [1], [0, 0, 1, 1], [], []>} : vector<8x16xbf16>, vector<16x32xbf16>, vector<8x32xf32> -> vector<8x32xf32>
    %c0_4 = arith.constant 0 : index
    %c0_5 = arith.constant 0 : index
    %15 = vector.load %arg8[%c0_4, %c0_5] : memref<8x32xf32, #tpu.memory_space<vmem>>, vector<8x32xf32>
    %c0_6 = arith.constant 0 : index
    %c0_7 = arith.constant 0 : index
    %16 = vector.load %arg4[%c0_6, %c0_7] : memref<32x32xf32, #tpu.memory_space<vmem>>, vector<32x32xf32>
    %cst_8 = arith.constant dense<0.000000e+00> : vector<8x32xf32>
    %17 = tpu.matmul %14, %16, %cst_8 {dimension_numbers = #tpu.dot_dimension_numbers<[1], [0], [0], [1], [0, 0, 1, 1], [], []>} : vector<8x32xf32>, vector<32x32xf32>, vector<8x32xf32> -> vector<8x32xf32>
    %18 = arith.addf %15, %17 : vector<8x32xf32>
    %c0_9 = arith.constant 0 : index
    %c0_10 = arith.constant 0 : index
    %19 = vector.load %arg8[%c0_9, %c0_10] : memref<8x32xf32, #tpu.memory_space<vmem>>, vector<8x32xf32>
    tpu.vector_store %arg8[%c0_9, %c0_10], %18 {strides = array<i32>} : memref<8x32xf32, #tpu.memory_space<vmem>>, vector<8x32xf32>,
    %c0_i32_11 = arith.constant 0 : i32
    %20 = arith.cmpi eq, %arg0, %c0_i32_11 : i32
    %21 = arith.extui %20 : i1 to i32
    %c0_i32_12 = arith.constant 0 : i32
    %22 = arith.cmpi ne, %21, %c0_i32_12 : i32
    scf.if %22 {
      %c0_13 = arith.constant 0 : index
      %c0_14 = arith.constant 0 : index
      %23 = vector.load %arg8[%c0_13, %c0_14] : memref<8x32xf32, #tpu.memory_space<vmem>>, vector<8x32xf32>
      %c0_15 = arith.constant 0 : index
      %c0_16 = arith.constant 0 : index
      %24 = vector.load %arg3[%c0_15, %c0_16] : memref<8x1xf32, #tpu.memory_space<vmem>>, vector<8x1xf32>
      %25 = vector.broadcast %24 : vector<8x1xf32> to vector<8x32xf32>
      %26 = arith.mulf %23, %25 : vector<8x32xf32>
      %c0_17 = arith.constant 0 : index
      %c0_18 = arith.constant 0 : index
      %27 = vector.load %arg5[%c0_17, %c0_18] : memref<32x128xf32, #tpu.memory_space<vmem>>, vector<32x128xf32>
      %cst_19 = arith.constant dense<0.000000e+00> : vector<8x128xf32>
      %28 = tpu.matmul %26, %27, %cst_19 {dimension_numbers = #tpu.dot_dimension_numbers<[1], [0], [0], [1], [0, 0, 1, 1], [], []>} : vector<8x32xf32>, vector<32x128xf32>, vector<8x128xf32> -> vector<8x128xf32>
      %c0_20 = arith.constant 0 : index
      %c0_21 = arith.constant 0 : index
      %29 = vector.load %arg6[%c0_20, %c0_21] : memref<1x128xf32, #tpu.memory_space<vmem>>, vector<1x128xf32>
      %30 = vector.broadcast %29 : vector<1x128xf32> to vector<8x128xf32>
      %31 = arith.addf %28, %30 : vector<8x128xf32>
      %c0_22 = arith.constant 0 : index
      %c0_23 = arith.constant 0 : index
      %32 = vector.load %arg7[%c0_22, %c0_23] : memref<8x128xf32, #tpu.memory_space<vmem>>, vector<8x128xf32>
      tpu.vector_store %arg7[%c0_22, %c0_23], %31 {strides = array<i32>} : memref<8x128xf32, #tpu.memory_space<vmem>>, vector<8x128xf32>,
    } else {
    }
    return
  }
  func.func @transform_0(%arg0: i32) -> (i32, i32) {
    %c0_i32 = arith.constant 0 : i32
    %c0_i32_0 = arith.constant 0 : i32
    %c0_i32_1 = arith.constant 0 : i32
    return %c0_i32, %c0_i32_0 : i32, i32
  }
  func.func @transform_1(%arg0: i32) -> (i32, i32) {
    %c0_i32 = arith.constant 0 : i32
    %c0_i32_0 = arith.constant 0 : i32
    %c0_i32_1 = arith.constant 0 : i32
    return %c0_i32, %c0_i32_0 : i32, i32
  }
  func.func @transform_2(%arg0: i32) -> (i32, i32) {
    %c0_i32 = arith.constant 0 : i32
    %c0_i32_0 = arith.constant 0 : i32
    %c0_i32_1 = arith.constant 0 : i32
    return %c0_i32, %c0_i32_0 : i32, i32
  }
  func.func @transform_3(%arg0: i32) -> (i32, i32) {
    %c0_i32 = arith.constant 0 : i32
    %c0_i32_0 = arith.constant 0 : i32
    return %arg0, %c0_i32 : i32, i32
  }
  func.func @transform_4(%arg0: i32) -> (i32, i32) {
    %c0_i32 = arith.constant 0 : i32
    %c0_i32_0 = arith.constant 0 : i32
    %c0_i32_1 = arith.constant 0 : i32
    return %c0_i32, %c0_i32_0 : i32, i32
  }
  func.func @transform_5(%arg0: i32) -> (i32, i32) {
    %c0_i32 = arith.constant 0 : i32
    %c0_i32_0 = arith.constant 0 : i32
    %c0_i32_1 = arith.constant 0 : i32
    return %c0_i32, %c0_i32_0 : i32, i32
  }
  func.func @transform_6(%arg0: i32) -> (i32, i32) {
    %c0_i32 = arith.constant 0 : i32
    %c0_i32_0 = arith.constant 0 : i32
    %c0_i32_1 = arith.constant 0 : i32
    return %c0_i32, %c0_i32_0 : i32, i32
  }
}

</mosaic_0001>

<bundles_post_ra>
// kernel: tpu_custom_call.1
= control target key start
LH: loop header
LB: loop body
LE: loop exit
PB: predicated region body
PF: predicated region fallthrough
CT: control target
= control target key end

     0   :  { %11 = vsyncpa [#allocation4], 0  ;;  %s524_s0 = inlined_call_operand.vmem [shape: s32[16,1], index: 0, kind: input, shape index: {}]   ;;  %s525_s1 = inlined_call_operand.vmem [shape: bf16[8,16], index: 1, kind: input, shape index: {}]   ;;  %s526_s2 = inlined_call_operand.vmem [shape: f32[8,1], index: 2, kind: input, shape index: {}]   ;;  %s527_s3 = inlined_call_operand.vmem [shape: f32[32,32], index: 3, kind: input, shape index: {}]   ;;  %s528_s4 = inlined_call_operand.hbm [shape: f32[32,128], index: 4, kind: input, shape index: {}]   ;;  %s529_s5 = inlined_call_operand.vmem [shape: f32[1,128], index: 5, kind: input, shape index: {}]   ;;  %s530_s6 = inlined_call_operand.hbm [shape: f32[8,128], index: 6, kind: output, shape index: {}]  }
   0x1   :  { %12 = vsyncpa [#allocation5], 0  ;;  %s422_s21 = smov [#allocation3]   ;;  %s374_s25 = scalar_lea.hbm %s528_s4, 512 }
   0x2   :  { %s26_s22 = sshll.u32 %s422_s21, 4  ;;  %p375_p0 = scmp.ne.s32.totalorder %s528_s4, %s374_s25  ;;  %s27_s22 = int_to_ptr.vmem [resolvable:$true] %s26_s22 }
   0x3   :  { %p378_p1 = scmp.lt.u32.totalorder %s374_s25, %s528_s4 }
   0x5   :  { %p380_p2 = pnand %p378_p1, %p375_p0 }
   0x7   :  { %383 = shalt.err (!%p380_p2)
}
   0x8   :  { %s384_s30 = scalar_lea.vmem %s27_s22, 512  ;;  %p389_p4 = scmp.lt.s32.totalorder %s27_s22, %s27_s22 }
   0x9   :  { %p385_p3 = scmp.ne.s32.totalorder %s27_s22, %s384_s30  ;;  %p390_p5 = scmp.lt.s32.totalorder %s384_s30, %s384_s30 }
   0xb   :  { %p391_p6 = por %p390_p5, %p389_p4 }
   0xd   :  { %p392_p7 = pnand %p391_p6, %p385_p3 }
   0xf   :  { %395 = shalt.err (!%p392_p7)
}
  0x10   :  { %s423_s7 = smov 128   ;;  %s424_s8 = smov 8  }
  0x11   :  { %32 = dma.hbm_to_vmem [thread:$0]  %s528_s4, 512, %s27_s22, [#allocation4], %s423_s7, %s423_s7, %s424_s8  }
  0x12   :  { %418 = dma.done.wait [#allocation4], 512  }
  0x13   :  { %419 = vsyncadd [#allocation4], 4294966784  ;;  %v425_v0 = vmov 0   ;;  %v45_v1 = vld [vmem:[%s524_s0] sm:$0xff]  ;;  %v46_v2 = vld [vmem:[%s524_s0 + $0x8] sm:$0xff]  ;;  %v426_v3 = vmov 0.0   ;;  %v47_v11 = vlaneseq }
  0x14   :  { %372 = vset.pattern.permute.xlu0 %v425_v0  ;;  %373 = vset.pattern.permute.xlu1 %v425_v0  ;;  %vm427_vm0 = vmmov 0   ;;  %v112_v4 = vld [vmem:[%s527_s3] sm:$0xff]  ;;  %v113_v5 = vld [vmem:[%s527_s3 + $0x8] sm:$0xff]  ;;  %v114_v6 = vld [vmem:[%s527_s3 + $0x10] sm:$0xff]  ;;  %v428_v7 = vmov 0.0|0.0   ;;  %vm67_vm4 = vcmask 130048  }
  0x15   :  { %54 = vperm.xlu0 %372, %v45_v1   ;;  %323 = vmatprep.subr.bf16.mxu0 %v426_v3  ;;  %v352_v8 = vpack.c.bf16 %v113_v5, %v112_v4  ;;  %v115_v9 = vld [vmem:[%s527_s3 + $0x18] sm:$0xff]  ;;  %v48_v13 = vand.u32 127, %v47_v11  ;;  %v429_v15 = vmov 1.0|1.0   ;;  %v66_v16 = vld [vmem:[%s525_s1] sm:$0xf] }
  0x16   :  { %325 = vmatprep.mubr.msk.bf16.mxu0 %vm427_vm0, %v426_v3  ;;  %337 = vmatprep.mubr.msk.f32.mxu1 %vm427_vm0, %v426_v3  ;;  %v355_v10 = vpack.c.bf16 %v115_v9, %v114_v6  ;;  %vm43_vm5 = vcmask 261120   ;;  %v196_v17 = vld [vmem:[%s526_s2] sm:$0xff]  ;;  %v203_v22 = vld [vmem:[#allocation3] sm:$0xff]  ;;  %v204_v23 = vld [vmem:[#allocation3 + $0x8] sm:$0xff]  ;;  %s430_s24 = smov [#allocation6]  }
  0x17   :  { %351 = vmatprep.subr.bf16.mxu1 %v428_v7  ;;  %44 = vst.msk [vmem:[#allocation2] sm:$0xff] %vm43_vm5, %v426_v3  ;;  %199 = vperm.xlu1 %373, %v196_v17   ;;  %v205_v24 = vld [vmem:[#allocation3 + $0x10] sm:$0xff]  ;;  %v358_v25 = vpack.c.bf16 %v204_v23, %v203_v22  ;;  %v206_v26 = vld [vmem:[#allocation3 + $0x18] sm:$0xff]  ;;  %s294_s25 = sshll.u32 %s430_s24, 4  ;;  %s295_s25 = int_to_ptr.vmem [resolvable:$true] %s294_s25 }
  0x18   :  { %353 = vmatpush3.bf16.msra.mxu1 %v352_v8  ;;  %v361_v27 = vpack.c.bf16 %v206_v26, %v205_v24  ;;  %v309_v35 = vld [vmem:[%s529_s5] ss:$0 sm:$0xff]  ;;  %s396_s26 = scalar_lea.vmem %s295_s25, 128  ;;  %p401_p9 = scmp.lt.s32.totalorder %s295_s25, %s295_s25 }
  0x19   :  { %57 = vperm.xlu0 %372, %v46_v2   ;;  %354 = vmatprep.subr.bf16.mxu1 %v428_v7  ;;  %p397_p8 = scmp.ne.s32.totalorder %s295_s25, %s396_s26  ;;  %p402_p10 = scmp.lt.s32.totalorder %s396_s26, %s396_s26 }
  0x1b   :  { %p403_p11 = por %p402_p10, %p401_p9 }
  0x1c   :  { %356 = vmatpush3.bf16.msra.mxu1 %v355_v10 }
  0x1d   :  { %p404_p12 = pnand %p403_p11, %p397_p8 }
  0x1e   :  { %v111_v28 = vld [vmem:[#allocation2] sm:$0xff] }
  0x94   :  { %v55_v12 = vpop.permute.xlu0 %54 }
  0x95   :  { %vm59_vm1 = vcmp.eq.s32.totalorder %v55_v12, %v48_v13 }
  0x96   :  { %v200_v32 = vpop.permute.xlu1 %199 }
  0x98   :  { %v58_v14 = vpop.permute.xlu0 %57 }
  0x99   :  { %vm60_vm2 = vcmp.eq.s32.totalorder %v58_v14, %v48_v13 }
  0x9a   :  { %vm305_vm3 = vmpackc.low %vm60_vm2, %vm59_vm1 }
  0x9b   :  { %324 = vmatpush3.bf16.msk.msra.mxu0 %vm305_vm3, %v429_v15 }
  0x9c   :  { %357 = vmatprep.subr.bf16.mxu0 %v428_v7 }
  0x9e   :  { %326 = vmatmul.mubr.msk.bf16.vlgmr.msra.gmra.mrb[0].mxu0 %vm67_vm4, %v66_v16 }
  0x9f   :  { %348 = vmatprep.mubr.msk.f32.mxu0 %vm427_vm0, %v426_v3  ;;  %359 = vmatpush3.bf16.msra.mxu0 %v358_v25 }
  0xa0   :  { %360 = vmatprep.subr.bf16.mxu0 %v428_v7 }
  0xa3   :  { %362 = vmatpush3.bf16.msra.mxu0 %v361_v27 }
 0x171   :  { %v105_v18 = vpop.f32.mrb[0].mxu0 }
 0x172   :  { %v327_v19 = vpop.f32.mrb[1].mxu0  ;;  %338 = vmatmul.mubr.msk.f32.vlgmr.msra.gmra.mrb[0].mxu1 %vm43_vm5, %v105_v18 }
 0x173   :  { %v108_v20 = vpop.f32.mrb[2].mxu0 }
 0x174   :  { %v328_v21 = vpop.f32.mrb[3].mxu0 }
 0x245   :  { %v186_v29 = vpop.f32.mrb[0].mxu1 }
 0x246   :  { %v190_v30 = vadd.f32 %v186_v29, %v111_v28  ;;  %v339_v31 = vpop.f32.mrb[1].mxu1 }
 0x248   :  { %191 = vst.msk [vmem:[#allocation2] sm:$0xff] %vm43_vm5, %v190_v30 }
 0x24f   :  { %v195_v33 = vld [vmem:[#allocation2] sm:$0xff] }
 0x250   :  { %v202_v34 = vmul.f32 %v200_v32, %v195_v33 }
 0x252   :  { %349 = vmatmul.mubr.msk.f32.vlgmr.msra.gmra.mrb[4].mxu0 %vm43_vm5, %v202_v34 }
 0x325   :  { %v283_v36 = vpop.f32.mrb[4].mxu0 }
 0x326   :  { %v284_v37 = vadd.f32 %v309_v35, %v283_v36  ;;  %v350_v38 = vpop.f32.mrb[5].mxu0 }
 0x328   :  { %287 = vst [vmem:[#allocation6] sm:$0xff] %v284_v37 }
 0x329   :  { %407 = shalt.err (!%p404_p12)
}
 0x32a   :  { %s408_s29 = scalar_lea.hbm %s530_s6, 128 }
 0x32b   :  { %p409_p13 = scmp.ne.s32.totalorder %s530_s6, %s408_s29  ;;  %p412_p0 = scmp.lt.u32.totalorder %s408_s29, %s530_s6 }
 0x32d   :  { %p414_p1 = pnand %p412_p0, %p409_p13 }
 0x32f   :  { %417 = shalt.err (!%p414_p1)
}
 0x330   :  { %297 = dma.vmem_to_hbm [thread:$0]  %s295_s25, 128, %s530_s6, [#allocation5]  }
 0x331   :  { %420 = dma.done.wait [#allocation5], 128  }
 0x332   :  { %421 = vsyncadd [#allocation5], 4294967168 }
 0x333   :  { %301 = vsyncpa [#allocation4], 1 }
 0x334   :  { %302 = vsyncpa [#allocation5], 1 }

</bundles_post_ra>
